<compile_context>
chip_gen: v5e
topology: v5e:2x2
jax: 0.10.0
libtpu: 0.0.40
codegen_flags: <defaults>
</compile_context>

<pallas_src>
import functools

import jax
import jax.numpy as jnp
from jax.experimental import pallas as pl
from jax.experimental.pallas import tpu as pltpu

LANE = 128  # TPU lane width: padding target for lane-dense matmuls / stores


def _round_up(n, m):
    return ((n + m - 1) // m) * m


def _mlp_kernel(x_ref, *refs, num_layers, carry_dtype):
    """Fully fused MLP: chain all Linear(+ReLU) layers; store only the final result.

    refs = (w1, b1, w2, b2, ..., wN, bN, out_ref); weights are (K_pad, N_pad) in the
    MXU compute dtype (bf16 by default), biases are (1, N_pad) f32.  Hidden
    activations are carried in `carry_dtype` (== weight dtype) so the per-layer cast
    before each matmul is a no-op; bias-add / ReLU epilogue stays in f32.
    """
    o_ref = refs[-1]
    wb = refs[:-1]
    h = x_ref[...]
    for i in range(num_layers):
        w = wb[2 * i][...]        # (K_pad, N_pad)  -- MXU inputs
        b = wb[2 * i + 1][...]    # (1, N_pad)      -- f32 epilogue
        y = jnp.dot(h.astype(w.dtype), w, preferred_element_type=jnp.float32) + b
        if i < num_layers - 1:
            y = jnp.maximum(y, 0.0)       # ReLU on hidden layers only (f32)
            h = y.astype(carry_dtype)     # single cast; carried narrow between layers
        else:
            h = y
    o_ref[...] = h.astype(o_ref.dtype)


def init_mlp_params(key, input_size, hidden_sizes, output_size, dtype=jnp.float32):
    """PyTorch-style Linear init: U(-1/sqrt(fan_in), 1/sqrt(fan_in)); W stored (in, out)."""
    sizes = [input_size] + list(hidden_sizes) + [output_size]
    params = []
    for i in range(len(sizes) - 1):
        fan_in, fan_out = sizes[i], sizes[i + 1]
        key, kw, kb = jax.random.split(key, 3)
        bound = float(fan_in) ** -0.5
        w = jax.random.uniform(kw, (fan_in, fan_out), dtype, -bound, bound)
        b = jax.random.uniform(kb, (fan_out,), dtype, -bound, bound)
        params.append((w, b))
    return params


def prepare_params(params, compute_dtype=jnp.bfloat16):
    """One-time layout prep for the fused kernel.

    Zero-pads every layer's output dim (and the following layer's input dim) up to a
    multiple of 128 so in-kernel matmuls and the single output store are lane-dense,
    casts weights to `compute_dtype` (bf16 -> full-rate MXU) and keeps biases in f32.
    NOTE: bf16 weights intentionally deviate from exact PyTorch f32 Linear semantics;
    pass compute_dtype=jnp.float32 for bit-faithful f32 compute.
    """
    prepared = []
    prev = params[0][0].shape[0]          # input feature dim: x itself is not padded
    for w, b in params:
        k, n = w.shape
        n_pad = _round_up(n, LANE)
        w_p = jnp.zeros((prev, n_pad), compute_dtype).at[:k, :n].set(w.astype(compute_dtype))
        b_p = jnp.zeros((1, n_pad), jnp.float32).at[0, :n].set(b.astype(jnp.float32))
        prepared.append((w_p, b_p))
        prev = n_pad
    return prepared


def _cost_estimate(B, d_in, prepared_params, x_dtype, n_out_pad):
    flops = 0
    wb_bytes = 0
    for w, b in prepared_params:
        flops += 2 * B * w.shape[0] * w.shape[1]
        wb_bytes += w.size * w.dtype.itemsize + b.size * b.dtype.itemsize
    itemsize = jnp.dtype(x_dtype).itemsize
    bytes_accessed = B * d_in * itemsize + wb_bytes + B * n_out_pad * itemsize
    return pl.CostEstimate(flops=flops, transcendentals=0, bytes_accessed=bytes_accessed)


def _vmem_estimate_bytes(tm, d_in, prepared_params, out_itemsize):
    """Rough pipeline-buffer footprint for the grid path (double-buffered tiles)."""
    n_out_pad = prepared_params[-1][0].shape[1]
    est = 2 * tm * d_in * 4                      # x tile (f32), double buffered
    est += 2 * tm * n_out_pad * out_itemsize     # out tile, double buffered
    for w, b in prepared_params:
        est += 2 * (w.size * w.dtype.itemsize + b.size * b.dtype.itemsize)  # resident (2x)
        est += tm * w.shape[1] * 4               # f32 intermediate live during the layer
    return est


def mlp_forward(x, prepared_params, output_size, *, batch_tile=1024, return_padded=False):
    """Fused forward pass: one pallas_call for the whole MLP.

    B <= 128       : no grid; everything is a single resident VMEM tile (latency-bound).
    B  > 128       : 1-D grid over the batch axis only, >= 2 tiles so both v7x
                     TensorCores get work ("parallel"); weights stay resident via
                     constant index_maps while the x/out tiles double-buffer.
    x may be passed in bf16 to halve the input DMA bytes (the first matmul cast is
    then a no-op).  With return_padded=True the lane-dense (B, 128) slab is returned
    as-is (columns >= output_size are zero padding) and the wrapper slice's extra
    HBM round trip is avoided.
    """
    B, d_in = x.shape
    num_layers = len(prepared_params)
    n_out_pad = prepared_params[-1][0].shape[1]
    compute_dtype = prepared_params[0][0].dtype

    flat = []
    for w, b in prepared_params:
        flat += [w, b]

    kernel = functools.partial(_mlp_kernel, num_layers=num_layers, carry_dtype=compute_dtype)
    out_shape = jax.ShapeDtypeStruct((B, n_out_pad), x.dtype)
    cost = _cost_estimate(B, d_in, prepared_params, x.dtype, n_out_pad)

    if B <= 128:
        # Gridless: the whole problem is one VMEM-resident tile.
        out = pl.pallas_call(
            kernel,
            out_shape=out_shape,
            in_specs=[pl.BlockSpec(memory_space=pltpu.MemorySpace.VMEM)] * (1 + 2 * num_layers),
            out_specs=pl.BlockSpec(memory_space=pltpu.MemorySpace.VMEM),
            cost_estimate=cost,
        )(x, *flat)
    else:
        # At least 2 tiles (v7x megacore), at most `batch_tile` rows per tile.
        tm = min(batch_tile, max(8, _round_up(-(-B // 2), 8)))
        in_specs = [pl.BlockSpec((tm, d_in), lambda i: (i, 0))]
        for w, b in prepared_params:
            in_specs.append(pl.BlockSpec(w.shape, lambda i: (0, 0)))   # resident weights
            in_specs.append(pl.BlockSpec(b.shape, lambda i: (0, 0)))   # resident biases

        out_itemsize = jnp.dtype(x.dtype).itemsize
        cp_kwargs = dict(dimension_semantics=("parallel",))
        est = _vmem_estimate_bytes(tm, d_in, prepared_params, out_itemsize)
        if est > (10 << 20):
            # Raise the scoped-VMEM limit only when the footprint would exceed the
            # conservative defaults; cap at v7x's 64 MiB physical VMEM.
            cp_kwargs["vmem_limit_bytes"] = min(64 << 20, int(est * 1.75) + (4 << 20))

        out = pl.pallas_call(
            kernel,
            out_shape=out_shape,
            grid=(pl.cdiv(B, tm),),
            in_specs=in_specs,
            out_specs=pl.BlockSpec((tm, n_out_pad), lambda i: (i, 0)),
            compiler_params=pltpu.CompilerParams(**cp_kwargs),
            cost_estimate=cost,
        )(x, *flat)

    if return_padded:
        return out                      # (B, n_out_pad); columns >= output_size are zeros
    return out[:, :output_size]


if __name__ == "__main__":
    # MLP(input_size=32, output_size=16, hidden_sizes=[64, 64], activation_fn=nn.ReLU,
    # dropout=0.0); batch=8 (gridless path) plus a larger, non-tile-multiple batch to
    # exercise the tiled "parallel" path with a partial last tile.
    key = jax.random.PRNGKey(0)
    kx, kp, kx2 = jax.random.split(key, 3)

    batch = 8
    input_size = 32
    hidden_sizes = [64, 64]
    output_size = 16

    x = jax.random.normal(kx, (batch, input_size), dtype=jnp.float32)
    params = init_mlp_params(kp, input_size, hidden_sizes, output_size)
    prepared = prepare_params(params)            # bf16 MXU inputs, f32 epilogue

    out = mlp_forward(x, prepared, output_size)
    out = jax.block_until_ready(out)
    assert out.shape == (batch, output_size)

    # Reference 1: same compute path in plain JAX (bf16 matmul inputs, f32 accumulate).
    def ref_bf16(xv):
        h = xv
        for i, (w, b) in enumerate(params):
            h = jnp.dot(h.astype(jnp.bfloat16), w.astype(jnp.bfloat16),
                        preferred_element_type=jnp.float32) + b.astype(jnp.float32)
            if i < len(params) - 1:
                h = jnp.maximum(h, 0.0)
        return h

    # Reference 2: pure-f32 module semantics (loose tolerance due to bf16 MXU inputs).
    def ref_f32(xv):
        h = xv
        for i, (w, b) in enumerate(params):
            h = h @ w + b
            if i < len(params) - 1:
                h = jnp.maximum(h, 0.0)
        return h

    assert jnp.allclose(out, ref_bf16(x), atol=2e-3, rtol=2e-3), "mismatch vs bf16 reference"
    assert jnp.allclose(out, ref_f32(x), atol=1e-1), "mismatch vs f32 module semantics"

    # Padded-slab path: same values in the first output_size columns, zeros beyond.
    out_pad = jax.block_until_ready(mlp_forward(x, prepared, output_size, return_padded=True))
    assert out_pad.shape == (batch, 128)
    assert jnp.allclose(out_pad[:, :output_size], out)
    assert jnp.all(out_pad[:, output_size:] == 0.0)

    # Exercise the batch-tiled ("parallel" M axis, resident weights, partial last tile) path.
    big_batch = 520
    x2 = jax.random.normal(kx2, (big_batch, input_size), dtype=jnp.float32)
    out2 = jax.block_until_ready(mlp_forward(x2, prepared, output_size))
    assert out2.shape == (big_batch, output_size)
    assert jnp.allclose(out2, ref_bf16(x2), atol=2e-3, rtol=2e-3), "tiled path mismatch"

    print("KERNEL_OK")
</pallas_src>

<mosaic_0001>
module attributes {stable_mosaic.version = 11 : i64} {
  func.func @_mlp_kernel(%arg0: memref<8x32xf32, #tpu.memory_space<vmem>>, %arg1: memref<32x128xbf16, #tpu.memory_space<vmem>>, %arg2: memref<1x128xf32, #tpu.memory_space<vmem>>, %arg3: memref<128x128xbf16, #tpu.memory_space<vmem>>, %arg4: memref<1x128xf32, #tpu.memory_space<vmem>>, %arg5: memref<128x128xbf16, #tpu.memory_space<vmem>>, %arg6: memref<1x128xf32, #tpu.memory_space<vmem>>, %arg7: memref<8x128xf32, #tpu.memory_space<vmem>>) attributes {dimension_semantics = [], scalar_prefetch = 0 : i64, scratch_operands = 0 : i64, tpu.core_type = #tpu.core_type<tc>} {
    %c0 = arith.constant 0 : index
    %c0_0 = arith.constant 0 : index
    %0 = vector.load %arg0[%c0, %c0_0] : memref<8x32xf32, #tpu.memory_space<vmem>>, vector<8x32xf32>
    %c0_1 = arith.constant 0 : index
    %c0_2 = arith.constant 0 : index
    %1 = vector.load %arg1[%c0_1, %c0_2] : memref<32x128xbf16, #tpu.memory_space<vmem>>, vector<32x128xbf16>
    %c0_3 = arith.constant 0 : index
    %c0_4 = arith.constant 0 : index
    %2 = vector.load %arg2[%c0_3, %c0_4] : memref<1x128xf32, #tpu.memory_space<vmem>>, vector<1x128xf32>
    %3 = arith.truncf %0 : vector<8x32xf32> to vector<8x32xbf16>
    %cst = arith.constant dense<0.000000e+00> : vector<8x128xf32>
    %4 = tpu.matmul %3, %1, %cst {dimension_numbers = #tpu.dot_dimension_numbers<[1], [0], [0], [1], [0, 0, 1, 1], [], []>} : vector<8x32xbf16>, vector<32x128xbf16>, vector<8x128xf32> -> vector<8x128xf32>
    %5 = vector.broadcast %2 : vector<1x128xf32> to vector<8x128xf32>
    %6 = arith.addf %4, %5 : vector<8x128xf32>
    %cst_5 = arith.constant 0.000000e+00 : f32
    %7 = vector.broadcast %cst_5 : f32 to vector<8x128xf32>
    %8 = arith.maximumf %6, %7 : vector<8x128xf32>
    %9 = arith.truncf %8 : vector<8x128xf32> to vector<8x128xbf16>
    %c0_6 = arith.constant 0 : index
    %c0_7 = arith.constant 0 : index
    %10 = vector.load %arg3[%c0_6, %c0_7] : memref<128x128xbf16, #tpu.memory_space<vmem>>, vector<128x128xbf16>
    %c0_8 = arith.constant 0 : index
    %c0_9 = arith.constant 0 : index
    %11 = vector.load %arg4[%c0_8, %c0_9] : memref<1x128xf32, #tpu.memory_space<vmem>>, vector<1x128xf32>
    %cst_10 = arith.constant dense<0.000000e+00> : vector<8x128xf32>
    %12 = tpu.matmul %9, %10, %cst_10 {dimension_numbers = #tpu.dot_dimension_numbers<[1], [0], [0], [1], [0, 0, 1, 1], [], []>} : vector<8x128xbf16>, vector<128x128xbf16>, vector<8x128xf32> -> vector<8x128xf32>
    %13 = vector.broadcast %11 : vector<1x128xf32> to vector<8x128xf32>
    %14 = arith.addf %12, %13 : vector<8x128xf32>
    %cst_11 = arith.constant 0.000000e+00 : f32
    %15 = vector.broadcast %cst_11 : f32 to vector<8x128xf32>
    %16 = arith.maximumf %14, %15 : vector<8x128xf32>
    %17 = arith.truncf %16 : vector<8x128xf32> to vector<8x128xbf16>
    %c0_12 = arith.constant 0 : index
    %c0_13 = arith.constant 0 : index
    %18 = vector.load %arg5[%c0_12, %c0_13] : memref<128x128xbf16, #tpu.memory_space<vmem>>, vector<128x128xbf16>
    %c0_14 = arith.constant 0 : index
    %c0_15 = arith.constant 0 : index
    %19 = vector.load %arg6[%c0_14, %c0_15] : memref<1x128xf32, #tpu.memory_space<vmem>>, vector<1x128xf32>
    %cst_16 = arith.constant dense<0.000000e+00> : vector<8x128xf32>
    %20 = tpu.matmul %17, %18, %cst_16 {dimension_numbers = #tpu.dot_dimension_numbers<[1], [0], [0], [1], [0, 0, 1, 1], [], []>} : vector<8x128xbf16>, vector<128x128xbf16>, vector<8x128xf32> -> vector<8x128xf32>
    %21 = vector.broadcast %19 : vector<1x128xf32> to vector<8x128xf32>
    %22 = arith.addf %20, %21 : vector<8x128xf32>
    %c0_17 = arith.constant 0 : index
    %c0_18 = arith.constant 0 : index
    %23 = vector.load %arg7[%c0_17, %c0_18] : memref<8x128xf32, #tpu.memory_space<vmem>>, vector<8x128xf32>
    tpu.vector_store %arg7[%c0_17, %c0_18], %22 {strides = array<i32>} : memref<8x128xf32, #tpu.memory_space<vmem>>, vector<8x128xf32>,
    return
  }
}

</mosaic_0001>

<bundles_post_ra>
// kernel: tpu_custom_call.1
= control target key start
LH: loop header
LB: loop body
LE: loop exit
PB: predicated region body
PF: predicated region fallthrough
CT: control target
= control target key end

     0   :  { %12 = vsyncpa [#allocation3], 0  ;;  %s614_s0 = inlined_call_operand.hbm [shape: f32[8,32], index: 0, kind: input, shape index: {}]   ;;  %s615_s1 = inlined_call_operand.hbm [shape: bf16[32,128], index: 1, kind: input, shape index: {}]   ;;  %s616_s2 = inlined_call_operand.vmem [shape: f32[1,128], index: 2, kind: input, shape index: {}]   ;;  %s617_s3 = inlined_call_operand.hbm [shape: bf16[128,128], index: 3, kind: input, shape index: {}]   ;;  %s618_s4 = inlined_call_operand.vmem [shape: f32[1,128], index: 4, kind: input, shape index: {}]   ;;  %s619_s5 = inlined_call_operand.hbm [shape: bf16[128,128], index: 5, kind: input, shape index: {}]   ;;  %s620_s6 = inlined_call_operand.vmem [shape: f32[1,128], index: 6, kind: input, shape index: {}]   ;;  %s621_s7 = inlined_call_operand.hbm [shape: f32[8,128], index: 7, kind: output, shape index: {}]  }
   0x1   :  { %13 = vsyncpa [#allocation6], 0 }
   0x2   :  { %14 = vsyncpa [#allocation9], 0  ;;  %s31_s26 = sshll.u32 %s615_s1, 4  ;;  %s32_s26 = int_to_ptr.hbm [resolvable:$true] %s31_s26 }
   0x3   :  { %15 = vsyncpa [#allocation4], 0  ;;  %s543_s27 = smov [#allocation5]   ;;  %s21_s8 = sshll.u32 %s614_s0, 4  ;;  %s22_s8 = int_to_ptr.hbm [resolvable:$true] %s21_s8 }
   0x4   :  { %s33_s28 = sshll.u32 %s543_s27, 4  ;;  %s544_s9 = smov 64   ;;  %s34_s28 = int_to_ptr.vmem [resolvable:$true] %s33_s28 }
   0x5   :  { %s545_s10 = smov 4   ;;  %s546_s11 = smov [#allocation2]  }
   0x6   :  { %39 = dma.hbm_to_vmem [thread:$0]  %s32_s26, 256, %s34_s28, [#allocation6], %s544_s9, %s544_s9, %s545_s10  }
   0x7   :  { %s23_s12 = sshll.u32 %s546_s11, 4  ;;  %s46_s15 = sshll.u32 %s617_s3, 4  ;;  %s24_s12 = int_to_ptr.vmem [resolvable:$true] %s23_s12  ;;  %s47_s15 = int_to_ptr.hbm [resolvable:$true] %s46_s15 }
   0x8   :  { %26 = dma.hbm_to_vmem [thread:$0]  %s22_s8, 128, %s24_s12, [#allocation3]  }
   0x9   :  { %s61_s17 = sshll.u32 %s619_s5, 4  ;;  %s547_s18 = smov [#allocation7]   ;;  %s62_s17 = int_to_ptr.hbm [resolvable:$true] %s61_s17 }
   0xa   :  { %s48_s19 = sshll.u32 %s547_s18, 4  ;;  %s548_s0 = smov [#allocation8]   ;;  %s49_s19 = int_to_ptr.vmem [resolvable:$true] %s48_s19 }
   0xb   :  { %54 = dma.hbm_to_vmem [thread:$0]  %s47_s15, 1024, %s49_s19, [#allocation6], %s544_s9, %s544_s9, %s545_s10  }
   0xc   :  { %s63_s20 = sshll.u32 %s548_s0, 4  ;;  %s64_s20 = int_to_ptr.vmem [resolvable:$true] %s63_s20 }
   0xd   :  { %69 = dma.hbm_to_vmem [thread:$0]  %s62_s17, 1024, %s64_s20, [#allocation9], %s544_s9, %s544_s9, %s545_s10  }
   0xe   :  { %535 = dma.done.wait [#allocation3], 128  }
   0xf   :  { %536 = vsyncadd [#allocation3], 4294967168 }
  0x10   :  { %537 = dma.done.wait [#allocation6], 1280  }
  0x11   :  { %538 = vsyncadd [#allocation6], 4294966016 }
  0x12   :  { %539 = dma.done.wait [#allocation9], 1024  }
  0x13   :  { %540 = vsyncadd [#allocation9], 4294966272  ;;  %v388_v0 = vld [vmem:[#allocation5 + $0x8] sm:$0xff]  ;;  %v387_v2 = vld [vmem:[#allocation5] sm:$0xff]  ;;  %vm111_vm0 = vcmask 261120   ;;  %s549_s24 = smov [#allocation10]  }
  0x14   :  { %v396_v1 = vld [vmem:[#allocation7 + $0x38] sm:$0xff]  ;;  %121 = vmatpush.bf16.msra.mxu0 %v388_v0  ;;  %v89_v3 = vld [vmem:[#allocation2] sm:$0xff]  ;;  %v395_v4 = vld [vmem:[#allocation7 + $0x30] sm:$0xff]  ;;  %s300_s25 = sshll.u32 %s549_s24, 4  ;;  %s302_s28 = sshll.u32 %s621_s7, 4  ;;  %s301_s25 = int_to_ptr.vmem [resolvable:$true] %s300_s25  ;;  %s303_s28 = int_to_ptr.hbm [resolvable:$true] %s302_s28 }
  0x15   :  { %198 = vmatpush.bf16.msra.mxu1 %v396_v1  ;;  %v95_v5 = vpack.c.bf16 %v89_v3, %v89_v3  ;;  %v394_v6 = vld [vmem:[#allocation7 + $0x28] sm:$0xff]  ;;  %v393_v7 = vld [vmem:[#allocation7 + $0x20] sm:$0xff]  ;;  %v392_v8 = vld [vmem:[#allocation7 + $0x18] sm:$0xff] }
  0x16   :  { %v391_v9 = vld [vmem:[#allocation7 + $0x10] sm:$0xff]  ;;  %v390_v10 = vld [vmem:[#allocation7 + $0x8] sm:$0xff]  ;;  %v389_v11 = vld [vmem:[#allocation7] sm:$0xff] }
  0x17   :  { %v404_v12 = vld [vmem:[#allocation8 + $0x38] sm:$0xff]  ;;  %v403_v13 = vld [vmem:[#allocation8 + $0x30] sm:$0xff]  ;;  %v402_v14 = vld [vmem:[#allocation8 + $0x28] sm:$0xff] }
  0x18   :  { %122 = vmatpush.bf16.msra.mxu0 %v387_v2  ;;  %281 = vmatpush.bf16.msra.mxu2 %v404_v12  ;;  %v401_v15 = vld [vmem:[#allocation8 + $0x20] sm:$0xff]  ;;  %v400_v16 = vld [vmem:[#allocation8 + $0x18] sm:$0xff]  ;;  %v399_v17 = vld [vmem:[#allocation8 + $0x10] sm:$0xff] }
  0x19   :  { %199 = vmatpush.bf16.msra.mxu1 %v395_v4  ;;  %v412_v18 = vld [vmem:[%s616_s2] ss:$0 sm:$0xff]  ;;  %v397_v25 = vld [vmem:[#allocation8] sm:$0xff] }
  0x1a   :  { %v398_v24 = vld [vmem:[#allocation8 + $0x8] sm:$0xff] }
  0x1b   :  { %322 = vmatmul.msk.bf16.vlgmr.msra.gmra.mxu0 %vm111_vm0, %v95_v5  ;;  %v413_v26 = vld [vmem:[%s618_s4] ss:$0 sm:$0xff] }
  0x1c   :  { %282 = vmatpush.bf16.msra.mxu2 %v403_v13  ;;  %v414_v32 = vld [vmem:[%s620_s6] ss:$0 sm:$0xff] }
  0x1d   :  { %200 = vmatpush.bf16.msra.mxu1 %v394_v6 }
  0x20   :  { %283 = vmatpush.bf16.msra.mxu2 %v402_v14 }
  0x21   :  { %201 = vmatpush.bf16.msra.mxu1 %v393_v7 }
  0x24   :  { %284 = vmatpush.bf16.msra.mxu2 %v401_v15 }
  0x25   :  { %202 = vmatpush.bf16.msra.mxu1 %v392_v8 }
  0x28   :  { %285 = vmatpush.bf16.msra.mxu2 %v400_v16 }
  0x29   :  { %203 = vmatpush.bf16.msra.mxu1 %v391_v9 }
  0x2c   :  { %286 = vmatpush.bf16.msra.mxu2 %v399_v17 }
  0x2d   :  { %204 = vmatpush.bf16.msra.mxu1 %v390_v10 }
  0x30   :  { %287 = vmatpush.bf16.msra.mxu2 %v398_v24 }
  0x31   :  { %205 = vmatpush.bf16.msra.mxu1 %v389_v11 }
  0x34   :  { %288 = vmatpush.bf16.msra.mxu2 %v397_v25 }
  0x98   :  { %v124_v19 = vpop.f32.mrf.mxu0 }
  0x99   :  { %v125_v20 = vadd.f32 %v412_v18, %v124_v19 }
  0x9b   :  { %v128_v21 = vmax.f32 %v125_v20, 0.0 }
  0x9d   :  { %v129_v22 = vpack.c.bf16 %v128_v21, %v128_v21 }
  0x9f   :  { %206 = vmatmul.bf16.vlgmr.msra.gmra.mxu1 %v129_v22 }
  0xa0   :  { %v126_v23 = vpop.f32.mrf.mxu0 }
 0x11c   :  { %v207_v27 = vpop.f32.mrf.mxu1 }
 0x11d   :  { %v208_v28 = vadd.f32 %v413_v26, %v207_v27 }
 0x11f   :  { %v211_v29 = vmax.f32 %v208_v28, 0.0 }
 0x121   :  { %v212_v30 = vpack.c.bf16 %v211_v29, %v211_v29 }
 0x123   :  { %289 = vmatmul.bf16.vlgmr.msra.gmra.mxu2 %v212_v30 }
 0x124   :  { %v209_v31 = vpop.f32.mrf.mxu1 }
 0x1a6   :  { %v290_v33 = vpop.f32.mrf.mxu2 }
 0x1a7   :  { %v291_v34 = vadd.f32 %v414_v32, %v290_v33 }
 0x1a9   :  { %294 = vst [vmem:[#allocation10] sm:$0xff] %v291_v34 }
 0x1aa   :  { %305 = dma.vmem_to_hbm [thread:$0]  %s301_s25, 128, %s303_s28, [#allocation4]  }
 0x1ae   :  { %v292_v35 = vpop.f32.mrf.mxu2 }
 0x1af   :  { %541 = dma.done.wait [#allocation4], 128  }
 0x1b0   :  { %542 = vsyncadd [#allocation4], 4294967168 }
 0x1b1   :  { %310 = vsyncpa [#allocation3], 1 }
 0x1b2   :  { %311 = vsyncpa [#allocation6], 1 }
 0x1b3   :  { %312 = vsyncpa [#allocation9], 1 }
 0x1b4   :  { %313 = vsyncpa [#allocation4], 1 }

</bundles_post_ra>
